<compile_context>
chip_gen: v7x
topology: tpu7x:2x2x1
jax: 0.10.0
libtpu: 0.0.40
codegen_flags: <defaults>
</compile_context>

<pallas_src>
import jax
import jax.numpy as jnp
from jax.experimental import pallas as pl
from jax.experimental.pallas import tpu as pltpu


# ---------------------------------------------------------------------------
# Pallas kernel: fused fc1 -> tanh -> fc2 -> tanh -> mean_layer -> tanh
# Operates on one batch tile; weights/biases are VMEM-resident (constant
# index_maps -> DMA'd once).
# ---------------------------------------------------------------------------
def actor_gaussian_kernel(s_ref, w1_ref, b1_ref, w2_ref, b2_ref,
                          w3_ref, b3_ref, o_ref):
    s = s_ref[...]
    h1 = jnp.tanh(
        jnp.dot(s, w1_ref[...], preferred_element_type=jnp.float32)
        + b1_ref[...]
    )
    h2 = jnp.tanh(
        jnp.dot(h1, w2_ref[...], preferred_element_type=jnp.float32)
        + b2_ref[...]
    )
    mean = jnp.tanh(
        jnp.dot(h2, w3_ref[...], preferred_element_type=jnp.float32)
        + b3_ref[...]
    )
    o_ref[...] = mean.astype(o_ref.dtype)


# ---------------------------------------------------------------------------
# Helpers
# ---------------------------------------------------------------------------
def _round_up(x, m):
    return ((x + m - 1) // m) * m


def _choose_batch_tile(B, batch_tile):
    """Pick the batch tile.

    Large tiles amortize per-grid-step overhead; capping at
    round_up(ceil(B/2), 8) keeps >= 2 grid steps whenever B > 8 so the
    "parallel" batch axis can feed both TensorCores on v7x.
    """
    if B <= 8:
        return 8
    half = _round_up(-(-B // 2), 8)
    return max(8, min(batch_tile, half))


# ---------------------------------------------------------------------------
# Wrapper: batch grid with resident weights, natural-width input/output.
# ---------------------------------------------------------------------------
def actor_gaussian_forward(s, w1, b1, w2, b2, w3, b3, *, batch_tile=1024):
    B, state_dim = s.shape
    hidden = w1.shape[1]
    action_dim = w3.shape[1]
    assert w1.shape == (state_dim, hidden)
    assert w2.shape == (hidden, hidden)
    assert w3.shape == (hidden, action_dim)

    tb = _choose_batch_tile(B, batch_tile)
    b_pad = _round_up(B, tb)
    nb = b_pad // tb

    # Keep the hot path free of extra full passes over s: cast only if
    # needed, pad only the batch dim and only if B is not a tile multiple.
    s_in = s if s.dtype == jnp.float32 else s.astype(jnp.float32)
    if b_pad != B:
        s_in = jnp.pad(s_in, ((0, b_pad - B), (0, 0)))

    out = pl.pallas_call(
        actor_gaussian_kernel,
        out_shape=jax.ShapeDtypeStruct((b_pad, action_dim), jnp.float32),
        grid=(nb,),
        in_specs=[
            # activations: blocked along batch, natural feature width
            # (last block dim == full array dim -> legal, lane-masked).
            pl.BlockSpec((tb, state_dim), lambda i: (i, 0)),
            # weights / biases: constant index_map -> VMEM-resident,
            # natural (unpadded) shapes.
            pl.BlockSpec((state_dim, hidden), lambda i: (0, 0)),
            pl.BlockSpec((1, hidden), lambda i: (0, 0)),
            pl.BlockSpec((hidden, hidden), lambda i: (0, 0)),
            pl.BlockSpec((1, hidden), lambda i: (0, 0)),
            pl.BlockSpec((hidden, action_dim), lambda i: (0, 0)),
            pl.BlockSpec((1, action_dim), lambda i: (0, 0)),
        ],
        # Output at its natural (B, action_dim) width: the masked partial
        # stores cost store-slot cycles, not HBM bandwidth, and we avoid
        # the 32x-padded writeback plus the trailing slice pass.
        out_specs=pl.BlockSpec((tb, action_dim), lambda i: (i, 0)),
        compiler_params=pltpu.CompilerParams(
            dimension_semantics=("parallel",)),
    )(s_in, w1, b1, w2, b2, w3, b3)

    return out[:B] if b_pad != B else out


# ---------------------------------------------------------------------------
# Deterministic parameter init (mirrors orthogonal_init from the module)
# ---------------------------------------------------------------------------
def orthogonal_init(key, in_dim, out_dim, gain=1.0):
    """Orthogonal weight of shape (in_dim, out_dim) + zero bias (1, out_dim)."""
    a = jax.random.normal(key, (max(in_dim, out_dim), min(in_dim, out_dim)),
                          dtype=jnp.float32)
    q, r = jnp.linalg.qr(a)
    d = jnp.diag(r)
    q = q * jnp.where(d >= 0, 1.0, -1.0)[None, :]   # deterministic sign fix
    if in_dim < out_dim:
        q = q.T                                     # -> (in_dim, out_dim)
    w = gain * q[:in_dim, :out_dim]
    b = jnp.zeros((1, out_dim), dtype=jnp.float32)
    return w.astype(jnp.float32), b


def make_params(key, state_dim, hidden_width, action_dim):
    k1, k2, k3 = jax.random.split(key, 3)
    w1, b1 = orthogonal_init(k1, state_dim, hidden_width, gain=1.0)
    w2, b2 = orthogonal_init(k2, hidden_width, hidden_width, gain=1.0)
    w3, b3 = orthogonal_init(k3, hidden_width, action_dim, gain=0.01)
    # log_std parameter exists in the module but is unused in forward().
    log_std = jnp.zeros((1, action_dim), dtype=jnp.float32)
    return (w1, b1, w2, b2, w3, b3), log_std


# ---------------------------------------------------------------------------
# Reference implementation (plain JAX) for sanity check
# ---------------------------------------------------------------------------
def reference_forward(s, w1, b1, w2, b2, w3, b3):
    h = jnp.tanh(s @ w1 + b1)
    h = jnp.tanh(h @ w2 + b2)
    return jnp.tanh(h @ w3 + b3)


if __name__ == "__main__":
    # Small shapes consistent with an RL actor network.
    state_dim = 16
    hidden_width = 32
    action_dim = 4

    key = jax.random.PRNGKey(0)
    k_params, k_small, k_big = jax.random.split(key, 3)

    (w1, b1, w2, b2, w3, b3), _log_std = make_params(
        k_params, state_dim, hidden_width, action_dim)

    # 1) tiny single-env-style batch (single grid step; overhead-bound by
    #    nature -- amortize by batching env steps in real use).
    s_small = jax.random.normal(k_small, (8, state_dim), dtype=jnp.float32)
    out_small = jax.block_until_ready(
        actor_gaussian_forward(s_small, w1, b1, w2, b2, w3, b3))
    ref_small = reference_forward(s_small, w1, b1, w2, b2, w3, b3)
    assert out_small.shape == (8, action_dim)
    assert jnp.allclose(out_small, ref_small, atol=1e-5, rtol=1e-5), \
        "small-batch mismatch vs reference"

    # 2) larger batch exercising the multi-tile parallel grid (>=2 steps,
    #    keeps both v7x TensorCores busy) + batch-remainder padding.
    s_big = jax.random.normal(k_big, (300, state_dim), dtype=jnp.float32)
    out_big = jax.block_until_ready(
        actor_gaussian_forward(s_big, w1, b1, w2, b2, w3, b3,
                               batch_tile=1024))
    ref_big = reference_forward(s_big, w1, b1, w2, b2, w3, b3)
    assert out_big.shape == (300, action_dim)
    assert jnp.allclose(out_big, ref_big, atol=1e-5, rtol=1e-5), \
        "large-batch mismatch vs reference"

    # TODO(synk): optional bf16 streaming of s / weights on v6e/v7x (halves
    # input HBM bytes) requires relaxing tolerance to ~1e-2; kept f32 here.
    print("KERNEL_OK")
</pallas_src>

<mosaic_0001>
module attributes {stable_mosaic.version = 11 : i64} {
  func.func @actor_gaussian_kernel(%arg0: i32, %arg1: memref<8x16xf32, #tpu.memory_space<vmem>>, %arg2: memref<16x32xf32, #tpu.memory_space<vmem>>, %arg3: memref<1x32xf32, #tpu.memory_space<vmem>>, %arg4: memref<32x32xf32, #tpu.memory_space<vmem>>, %arg5: memref<1x32xf32, #tpu.memory_space<vmem>>, %arg6: memref<32x4xf32, #tpu.memory_space<vmem>>, %arg7: memref<1x4xf32, #tpu.memory_space<vmem>>, %arg8: memref<8x4xf32, #tpu.memory_space<vmem>>) attributes {dimension_semantics = [#tpu.dimension_semantics<parallel>], iteration_bounds = array<i64: 1>, scalar_prefetch = 0 : i64, scratch_operands = 0 : i64, tpu.core_type = #tpu.core_type<tc>, window_params = [{transform_indices = @transform_0, window_bounds = array<i64: 8, 16>}, {pipeline_mode = #tpu.pipeline_mode<synchronous>, transform_indices = @transform_1, window_bounds = array<i64: 16, 32>}, {pipeline_mode = #tpu.pipeline_mode<synchronous>, transform_indices = @transform_2, window_bounds = array<i64: 1, 32>}, {pipeline_mode = #tpu.pipeline_mode<synchronous>, transform_indices = @transform_3, window_bounds = array<i64: 32, 32>}, {pipeline_mode = #tpu.pipeline_mode<synchronous>, transform_indices = @transform_4, window_bounds = array<i64: 1, 32>}, {pipeline_mode = #tpu.pipeline_mode<synchronous>, transform_indices = @transform_5, window_bounds = array<i64: 32, 4>}, {pipeline_mode = #tpu.pipeline_mode<synchronous>, transform_indices = @transform_6, window_bounds = array<i64: 1, 4>}, {transform_indices = @transform_7, window_bounds = array<i64: 8, 4>}]} {
    %c0 = arith.constant 0 : index
    %c0_0 = arith.constant 0 : index
    %0 = vector.load %arg1[%c0, %c0_0] : memref<8x16xf32, #tpu.memory_space<vmem>>, vector<8x16xf32>
    %c0_1 = arith.constant 0 : index
    %c0_2 = arith.constant 0 : index
    %1 = vector.load %arg2[%c0_1, %c0_2] : memref<16x32xf32, #tpu.memory_space<vmem>>, vector<16x32xf32>
    %cst = arith.constant dense<0.000000e+00> : vector<8x32xf32>
    %2 = tpu.matmul %0, %1, %cst {dimension_numbers = #tpu.dot_dimension_numbers<[1], [0], [0], [1], [0, 0, 1, 1], [], []>} : vector<8x16xf32>, vector<16x32xf32>, vector<8x32xf32> -> vector<8x32xf32>
    %c0_3 = arith.constant 0 : index
    %c0_4 = arith.constant 0 : index
    %3 = vector.load %arg3[%c0_3, %c0_4] : memref<1x32xf32, #tpu.memory_space<vmem>>, vector<1x32xf32>
    %4 = vector.broadcast %3 : vector<1x32xf32> to vector<8x32xf32>
    %5 = arith.addf %2, %4 : vector<8x32xf32>
    %6 = math.tanh %5 : vector<8x32xf32>
    %c0_5 = arith.constant 0 : index
    %c0_6 = arith.constant 0 : index
    %7 = vector.load %arg4[%c0_5, %c0_6] : memref<32x32xf32, #tpu.memory_space<vmem>>, vector<32x32xf32>
    %cst_7 = arith.constant dense<0.000000e+00> : vector<8x32xf32>
    %8 = tpu.matmul %6, %7, %cst_7 {dimension_numbers = #tpu.dot_dimension_numbers<[1], [0], [0], [1], [0, 0, 1, 1], [], []>} : vector<8x32xf32>, vector<32x32xf32>, vector<8x32xf32> -> vector<8x32xf32>
    %c0_8 = arith.constant 0 : index
    %c0_9 = arith.constant 0 : index
    %9 = vector.load %arg5[%c0_8, %c0_9] : memref<1x32xf32, #tpu.memory_space<vmem>>, vector<1x32xf32>
    %10 = vector.broadcast %9 : vector<1x32xf32> to vector<8x32xf32>
    %11 = arith.addf %8, %10 : vector<8x32xf32>
    %12 = math.tanh %11 : vector<8x32xf32>
    %c0_10 = arith.constant 0 : index
    %c0_11 = arith.constant 0 : index
    %13 = vector.load %arg6[%c0_10, %c0_11] : memref<32x4xf32, #tpu.memory_space<vmem>>, vector<32x4xf32>
    %cst_12 = arith.constant dense<0.000000e+00> : vector<8x4xf32>
    %14 = tpu.matmul %12, %13, %cst_12 {dimension_numbers = #tpu.dot_dimension_numbers<[1], [0], [0], [1], [0, 0, 1, 1], [], []>} : vector<8x32xf32>, vector<32x4xf32>, vector<8x4xf32> -> vector<8x4xf32>
    %c0_13 = arith.constant 0 : index
    %c0_14 = arith.constant 0 : index
    %15 = vector.load %arg7[%c0_13, %c0_14] : memref<1x4xf32, #tpu.memory_space<vmem>>, vector<1x4xf32>
    %16 = vector.broadcast %15 : vector<1x4xf32> to vector<8x4xf32>
    %17 = arith.addf %14, %16 : vector<8x4xf32>
    %18 = math.tanh %17 : vector<8x4xf32>
    %c0_15 = arith.constant 0 : index
    %c0_16 = arith.constant 0 : index
    %19 = vector.load %arg8[%c0_15, %c0_16] : memref<8x4xf32, #tpu.memory_space<vmem>>, vector<8x4xf32>
    tpu.vector_store %arg8[%c0_15, %c0_16], %18 {strides = array<i32>} : memref<8x4xf32, #tpu.memory_space<vmem>>, vector<8x4xf32>,
    return
  }
  func.func @transform_0(%arg0: i32) -> (i32, i32) {
    %c0_i32 = arith.constant 0 : i32
    %c0_i32_0 = arith.constant 0 : i32
    return %arg0, %c0_i32 : i32, i32
  }
  func.func @transform_1(%arg0: i32) -> (i32, i32) {
    %c0_i32 = arith.constant 0 : i32
    %c0_i32_0 = arith.constant 0 : i32
    %c0_i32_1 = arith.constant 0 : i32
    return %c0_i32, %c0_i32_0 : i32, i32
  }
  func.func @transform_2(%arg0: i32) -> (i32, i32) {
    %c0_i32 = arith.constant 0 : i32
    %c0_i32_0 = arith.constant 0 : i32
    %c0_i32_1 = arith.constant 0 : i32
    return %c0_i32, %c0_i32_0 : i32, i32
  }
  func.func @transform_3(%arg0: i32) -> (i32, i32) {
    %c0_i32 = arith.constant 0 : i32
    %c0_i32_0 = arith.constant 0 : i32
    %c0_i32_1 = arith.constant 0 : i32
    return %c0_i32, %c0_i32_0 : i32, i32
  }
  func.func @transform_4(%arg0: i32) -> (i32, i32) {
    %c0_i32 = arith.constant 0 : i32
    %c0_i32_0 = arith.constant 0 : i32
    %c0_i32_1 = arith.constant 0 : i32
    return %c0_i32, %c0_i32_0 : i32, i32
  }
  func.func @transform_5(%arg0: i32) -> (i32, i32) {
    %c0_i32 = arith.constant 0 : i32
    %c0_i32_0 = arith.constant 0 : i32
    %c0_i32_1 = arith.constant 0 : i32
    return %c0_i32, %c0_i32_0 : i32, i32
  }
  func.func @transform_6(%arg0: i32) -> (i32, i32) {
    %c0_i32 = arith.constant 0 : i32
    %c0_i32_0 = arith.constant 0 : i32
    %c0_i32_1 = arith.constant 0 : i32
    return %c0_i32, %c0_i32_0 : i32, i32
  }
  func.func @transform_7(%arg0: i32) -> (i32, i32) {
    %c0_i32 = arith.constant 0 : i32
    %c0_i32_0 = arith.constant 0 : i32
    return %arg0, %c0_i32 : i32, i32
  }
}

</mosaic_0001>

<bundles_post_ra>
// kernel: tpu_custom_call.1
= control target key start
LH: loop header
LB: loop body
LE: loop exit
PB: predicated region body
PF: predicated region fallthrough
CT: control target
= control target key end

     0   :  { %12 = vsyncpa [#allocation3], 0  ;;  %s402_s24 = smov [#allocation2]   ;;  %s501_s0 = inlined_call_operand.vmem [shape: f32[8,16], index: 0, kind: input, shape index: {}]   ;;  %s502_s1 = inlined_call_operand.hbm [shape: f32[16,32], index: 1, kind: input, shape index: {}]   ;;  %s503_s2 = inlined_call_operand.vmem [shape: f32[1,32], index: 2, kind: input, shape index: {}]   ;;  %s504_s3 = inlined_call_operand.vmem [shape: f32[32,32], index: 3, kind: input, shape index: {}]   ;;  %s505_s4 = inlined_call_operand.vmem [shape: f32[1,32], index: 4, kind: input, shape index: {}]   ;;  %s506_s5 = inlined_call_operand.vmem [shape: f32[32,4], index: 5, kind: input, shape index: {}]   ;;  %s507_s6 = inlined_call_operand.vmem [shape: f32[1,4], index: 6, kind: input, shape index: {}]   ;;  %s508_s7 = inlined_call_operand.vmem [shape: f32[8,4], index: 7, kind: output, shape index: {}]  }
   0x1   :  { %s20_s25 = sshll.u32 %s402_s24, 4  ;;  %s378_s28 = scalar_lea.hbm %s502_s1, 256  ;;  %s21_s25 = int_to_ptr.vmem [resolvable:$true] %s20_s25 }
   0x2   :  { %p379_p0 = scmp.ne.s32.totalorder %s502_s1, %s378_s28  ;;  %p382_p1 = scmp.lt.u32.totalorder %s378_s28, %s502_s1 }
   0x4   :  { %p384_p2 = pnand %p382_p1, %p379_p0 }
   0x6   :  { %387 = shalt.err (!%p384_p2)
}
   0x7   :  { %s388_s10 = scalar_lea.vmem %s21_s25, 256  ;;  %p393_p4 = scmp.lt.s32.totalorder %s21_s25, %s21_s25 }
   0x8   :  { %p389_p3 = scmp.ne.s32.totalorder %s21_s25, %s388_s10  ;;  %p394_p5 = scmp.lt.s32.totalorder %s388_s10, %s388_s10 }
   0xa   :  { %p395_p6 = por %p394_p5, %p393_p4 }
   0xc   :  { %p396_p7 = pnand %p395_p6, %p389_p3 }
   0xe   :  { %399 = shalt.err (!%p396_p7)
}
   0xf   :  { %s403_s11 = smov 128   ;;  %s404_s12 = smov 8  }
  0x10   :  { %26 = dma.hbm_to_vmem [thread:$0]  %s502_s1, 256, %s21_s25, [#allocation3], %s403_s11, %s403_s11, %s404_s12  }
  0x11   :  { %400 = dma.done.wait [#allocation3], 256  }
  0x12   :  { %401 = vsyncadd [#allocation3], 4294967040  ;;  %v405_v0 = vmov 0.0|0.0   ;;  %vm406_vm0 = vmmov 0   ;;  %v407_v1 = vmov 0.0   ;;  %v41_v2 = vld [vmem:[#allocation2] sm:$0xff] }
  0x13   :  { %351 = vmatprep.subr.bf16.mxu0 %v405_v0  ;;  %326 = vmatprep.mubr.msk.f32.mxu0 %vm406_vm0, %v407_v1  ;;  %v42_v3 = vld [vmem:[#allocation2 + $0x8] sm:$0xff]  ;;  %v40_v5 = vld [vmem:[%s501_s0] sm:$0xff]  ;;  %vm50_vm1 = vcmask 130048   ;;  %v127_v8 = vld [vmem:[%s504_s3 + $0x10] sm:$0xff]  ;;  %vm136_vm2 = vcmask 261120   ;;  %vm296_vm3 = vcmask 31744  }
  0x14   :  { %354 = vmatprep.subr.bf16.mxu1 %v405_v0  ;;  %337 = vmatprep.mubr.msk.f32.mxu1 %vm406_vm0, %v407_v1  ;;  %v352_v4 = vpack.c.bf16 %v42_v3, %v41_v2  ;;  %v125_v6 = vld [vmem:[%s504_s3] sm:$0xff]  ;;  %v126_v7 = vld [vmem:[%s504_s3 + $0x8] sm:$0xff]  ;;  %v128_v10 = vld [vmem:[%s504_s3 + $0x18] sm:$0xff] }
  0x15   :  { %v355_v9 = vpack.c.bf16 %v126_v7, %v125_v6  ;;  %v358_v11 = vpack.c.bf16 %v128_v10, %v127_v8  ;;  %v303_v12 = vld [vmem:[%s503_s2] ss:$0 sm:$0xff]  ;;  %v212_v18 = vld [vmem:[%s506_s5 + $0x8] sm:$0xff]  ;;  %v213_v19 = vld [vmem:[%s506_s5 + $0x10] sm:$0xff] }
  0x16   :  { %353 = vmatpush3.bf16.msra.mxu0 %v352_v4  ;;  %v211_v17 = vld [vmem:[%s506_s5] sm:$0xff]  ;;  %v214_v21 = vld [vmem:[%s506_s5 + $0x18] sm:$0xff] }
  0x17   :  { %360 = vmatprep.subr.bf16.mxu0 %v405_v0  ;;  %356 = vmatpush3.bf16.msra.mxu1 %v355_v9  ;;  %v361_v20 = vpack.c.bf16 %v212_v18, %v211_v17  ;;  %v364_v22 = vpack.c.bf16 %v214_v21, %v213_v19  ;;  %v305_v23 = vld [vmem:[%s505_s4] ss:$0 sm:$0xff] }
  0x18   :  { %357 = vmatprep.subr.bf16.mxu1 %v405_v0  ;;  %v307_v28 = vld [vmem:[%s507_s6] ss:$0 sm:$0xff] }
  0x19   :  { %327 = vmatmul.mubr.msk.f32.vlgmr.msra.gmra.mrb[0].mxu0 %vm50_vm1, %v40_v5 }
  0x1a   :  { %348 = vmatprep.mubr.msk.f32.mxu0 %vm406_vm0, %v407_v1  ;;  %362 = vmatpush3.bf16.msra.mxu0 %v361_v20 }
  0x1b   :  { %359 = vmatpush3.bf16.msra.mxu1 %v358_v11  ;;  %363 = vmatprep.subr.bf16.mxu0 %v405_v0 }
  0x1e   :  { %365 = vmatpush3.bf16.msra.mxu0 %v364_v22 }
  0xec   :  { %v120_v13 = vpop.f32.mrb[0].mxu0 }
  0xed   :  { %v121_v14 = vadd.f32 %v303_v12, %v120_v13  ;;  %v328_v15 = vpop.f32.mrb[1].mxu0 }
  0xef   :  { %372 = vtanh.f32 %v121_v14 }
  0xf9   :  { %v373_v16 = vpop.eup %372 }
  0xfa   :  { %338 = vmatmul.mubr.msk.f32.vlgmr.msra.gmra.mrb[0].mxu1 %vm136_vm2, %v373_v16 }
 0x1cd   :  { %v206_v24 = vpop.f32.mrb[0].mxu1 }
 0x1ce   :  { %v207_v25 = vadd.f32 %v305_v23, %v206_v24  ;;  %v339_v26 = vpop.f32.mrb[1].mxu1 }
 0x1d0   :  { %374 = vtanh.f32 %v207_v25 }
 0x1da   :  { %v375_v27 = vpop.eup %374 }
 0x1db   :  { %349 = vmatmul.mubr.msk.f32.vlgmr.msra.gmra.mrb[2].mxu0 %vm136_vm2, %v375_v27 }
 0x2ae   :  { %v291_v29 = vpop.f32.mrb[2].mxu0 }
 0x2af   :  { %v292_v30 = vadd.f32 %v307_v28, %v291_v29  ;;  %v350_v31 = vpop.f32.mrb[3].mxu0 }
 0x2b1   :  { %376 = vtanh.f32 %v292_v30 }
 0x2bb   :  { %v377_v32 = vpop.eup %376 }
 0x2bc   :  { %297 = vst.msk [vmem:[%s508_s7] sm:$0xff] %vm296_vm3, %v377_v32 }
 0x2bd   :  { %302 = vsyncpa [#allocation3], 1 }

</bundles_post_ra>
